<compile_context>
chip_gen: v7x
topology: tpu7x:2x2x1
jax: 0.10.0
libtpu: 0.0.40
codegen_flags: <defaults>
</compile_context>

<pallas_src>
import math

import jax
import jax.numpy as jnp
from jax.experimental import pallas as pl
from jax.experimental.pallas import tpu as pltpu


def _mlp_proj_kernel(x_ref, w1_ref, b1_ref, w2_ref, b2_ref, g_ref, beta_ref, o_ref):
    x = x_ref[...]

    # Linear 1 (MXU), f32 accumulation regardless of operand dtype.
    h = jnp.dot(x, w1_ref[...], preferred_element_type=jnp.float32)
    h = h + b1_ref[...].astype(jnp.float32)

    # Exact GELU: 0.5 * h * (1 + erf(h / sqrt(2)))  (torch.nn.GELU default).
    inv_sqrt2 = jnp.float32(1.0 / math.sqrt(2.0))
    h = jnp.float32(0.5) * h * (jnp.float32(1.0) + jax.lax.erf(h * inv_sqrt2))

    # Linear 2 (MXU). Cast the activation to the weight dtype so a bf16 weight
    # keeps the full-rate MXU path; accumulation stays f32.
    y = jnp.dot(h.astype(w2_ref.dtype), w2_ref[...],
                preferred_element_type=jnp.float32)
    y = y + b2_ref[...].astype(jnp.float32)

    # LayerNorm over the last dim (eps = 1e-5, affine).
    # Fused: independent row_sum / row_sumsq reductions, single rsqrt (EUP).
    d = y.shape[-1]
    inv_d = jnp.float32(1.0 / d)
    row_sum = jnp.sum(y, axis=-1, keepdims=True)
    row_sumsq = jnp.sum(y * y, axis=-1, keepdims=True)
    mean = row_sum * inv_d
    var = row_sumsq * inv_d - mean * mean
    y_norm = (y - mean) * jax.lax.rsqrt(var + jnp.float32(1e-5))

    o_ref[...] = (y_norm * g_ref[...].astype(jnp.float32)
                  + beta_ref[...].astype(jnp.float32)).astype(o_ref.dtype)


def _round_up(a, b):
    return ((a + b - 1) // b) * b


def _pick_row_tile(m, clip_dim, cross_dim, x_bytes, w_bytes,
                   budget=28 * 1024 * 1024):
    """Largest row tile whose resident VMEM footprint fits the budget."""
    resident_weights = (clip_dim * clip_dim + clip_dim * cross_dim) * w_bytes \
        + (clip_dim + 3 * cross_dim) * w_bytes
    m8 = _round_up(max(m, 1), 8)
    for tm in (512, 256, 128, 64, 32, 16, 8):
        if tm > m8:
            continue
        # Double-buffered x / out tiles + f32 intermediates (h, y, y_norm).
        io_tiles = 2 * tm * clip_dim * x_bytes + 2 * tm * cross_dim * x_bytes
        intermediates = 4 * tm * (clip_dim + 2 * cross_dim)
        if resident_weights + io_tiles + intermediates <= budget:
            return tm
    return 8


def mlp_proj_model(image_embeds, params):
    """image_embeds: [..., clip_embeddings_dim] -> [..., cross_attention_dim]"""
    w1, b1, w2, b2, gamma, beta = (
        params["w1"], params["b1"], params["w2"], params["b2"],
        params["gamma"], params["beta"],
    )
    clip_dim = w1.shape[0]
    cross_dim = w2.shape[1]
    assert image_embeds.shape[-1] == clip_dim

    lead_shape = image_embeds.shape[:-1]
    m = math.prod(lead_shape) if lead_shape else 1
    x2d = image_embeds.reshape(m, clip_dim)

    x_bytes = x2d.dtype.itemsize
    w_bytes = w1.dtype.itemsize
    tm = _pick_row_tile(m, clip_dim, cross_dim, x_bytes, w_bytes)
    m_pad = _round_up(m, tm)
    if m_pad != m:
        x2d = jnp.pad(x2d, ((0, m_pad - m), (0, 0)))
    grid = (m_pad // tm,)

    # Biases / LN params presented as (1, D) so they broadcast over rows.
    b1_2d = b1.reshape(1, clip_dim)
    b2_2d = b2.reshape(1, cross_dim)
    g_2d = gamma.reshape(1, cross_dim)
    beta_2d = beta.reshape(1, cross_dim)

    param_bytes = sum(int(p.size) * p.dtype.itemsize
                      for p in (w1, b1, w2, b2, gamma, beta))
    cost = pl.CostEstimate(
        flops=2 * m * clip_dim * (clip_dim + cross_dim)
        + 10 * m * (clip_dim + cross_dim),
        transcendentals=m * (clip_dim + 1),      # erf per hidden elem + rsqrt per row
        bytes_accessed=m * clip_dim * x_bytes
        + m * cross_dim * image_embeds.dtype.itemsize
        + param_bytes,
    )

    out = pl.pallas_call(
        _mlp_proj_kernel,
        out_shape=jax.ShapeDtypeStruct((m_pad, cross_dim), image_embeds.dtype),
        grid=grid,
        in_specs=[
            pl.BlockSpec((tm, clip_dim), lambda i: (i, 0)),          # x tile (pipelined)
            pl.BlockSpec((clip_dim, clip_dim), lambda i: (0, 0)),    # w1 (resident)
            pl.BlockSpec((1, clip_dim), lambda i: (0, 0)),           # b1
            pl.BlockSpec((clip_dim, cross_dim), lambda i: (0, 0)),   # w2 (resident)
            pl.BlockSpec((1, cross_dim), lambda i: (0, 0)),          # b2
            pl.BlockSpec((1, cross_dim), lambda i: (0, 0)),          # gamma
            pl.BlockSpec((1, cross_dim), lambda i: (0, 0)),          # beta
        ],
        out_specs=pl.BlockSpec((tm, cross_dim), lambda i: (i, 0)),   # out tile (pipelined)
        compiler_params=pltpu.CompilerParams(
            dimension_semantics=("parallel",),   # megacore on v7x, no-op elsewhere
            vmem_limit_bytes=48 * 1024 * 1024,
        ),
        cost_estimate=cost,
    )(x2d, w1, b1_2d, w2, b2_2d, g_2d, beta_2d)

    if m_pad != m:
        out = out[:m]
    return out.reshape(*lead_shape, cross_dim)


def init_params(key, cross_attention_dim, clip_embeddings_dim, dtype=jnp.float32):
    """Deterministic synthetic init mirroring the torch module's shapes.

    Weights are stored transposed relative to torch (in_dim, out_dim) so the
    kernel computes x @ W directly. Pass dtype=jnp.bfloat16 for the fast MXU
    path (f32 accumulation is kept inside the kernel).
    """
    k1, k2, k3, k4 = jax.random.split(key, 4)
    s1 = 1.0 / math.sqrt(clip_embeddings_dim)
    w1 = jax.random.uniform(k1, (clip_embeddings_dim, clip_embeddings_dim),
                            dtype, minval=-s1, maxval=s1)
    b1 = jax.random.uniform(k2, (clip_embeddings_dim,), dtype, minval=-s1, maxval=s1)
    w2 = jax.random.uniform(k3, (clip_embeddings_dim, cross_attention_dim),
                            dtype, minval=-s1, maxval=s1)
    b2 = jax.random.uniform(k4, (cross_attention_dim,), dtype, minval=-s1, maxval=s1)
    gamma = jnp.ones((cross_attention_dim,), dtype)   # nn.LayerNorm default
    beta = jnp.zeros((cross_attention_dim,), dtype)
    return {"w1": w1, "b1": b1, "w2": w2, "b2": b2, "gamma": gamma, "beta": beta}


if __name__ == "__main__":
    # Small shapes consistent with the module: batch=2, seq=8 image tokens,
    # clip_embeddings_dim=32, cross_attention_dim=64.
    batch, seq = 2, 8
    clip_dim, cross_dim = 32, 64

    key = jax.random.PRNGKey(0)
    k_params, k_x = jax.random.split(key)
    params = init_params(k_params, cross_attention_dim=cross_dim,
                         clip_embeddings_dim=clip_dim)
    image_embeds = jax.random.normal(k_x, (batch, seq, clip_dim), jnp.float32)

    out = mlp_proj_model(image_embeds, params)
    jax.block_until_ready(out)

    # Pure-JAX reference for a sanity check (exact-erf GELU, eps=1e-5 LN).
    def ref(x, p):
        h = x @ p["w1"] + p["b1"]
        h = jax.nn.gelu(h, approximate=False)
        y = h @ p["w2"] + p["b2"]
        mean = jnp.mean(y, axis=-1, keepdims=True)
        var = jnp.mean((y - mean) ** 2, axis=-1, keepdims=True)
        yn = (y - mean) * jax.lax.rsqrt(var + 1e-5)
        return yn * p["gamma"] + p["beta"]

    ref_out = ref(image_embeds, params)
    assert out.shape == (batch, seq, cross_dim)
    assert jnp.allclose(out, ref_out, atol=1e-4, rtol=1e-4), (
        float(jnp.max(jnp.abs(out - ref_out))))

    print("KERNEL_OK")
</pallas_src>

<mosaic_0001>
module attributes {stable_mosaic.version = 11 : i64} {
  func.func @_mlp_proj_kernel(%arg0: i32, %arg1: memref<16x32xf32, #tpu.memory_space<vmem>>, %arg2: memref<32x32xf32, #tpu.memory_space<vmem>>, %arg3: memref<1x32xf32, #tpu.memory_space<vmem>>, %arg4: memref<32x64xf32, #tpu.memory_space<vmem>>, %arg5: memref<1x64xf32, #tpu.memory_space<vmem>>, %arg6: memref<1x64xf32, #tpu.memory_space<vmem>>, %arg7: memref<1x64xf32, #tpu.memory_space<vmem>>, %arg8: memref<16x64xf32, #tpu.memory_space<vmem>>) attributes {dimension_semantics = [#tpu.dimension_semantics<parallel>], iteration_bounds = array<i64: 1>, scalar_prefetch = 0 : i64, scratch_operands = 0 : i64, tpu.core_type = #tpu.core_type<tc>, window_params = [{transform_indices = @transform_0, window_bounds = array<i64: 16, 32>}, {pipeline_mode = #tpu.pipeline_mode<synchronous>, transform_indices = @transform_1, window_bounds = array<i64: 32, 32>}, {pipeline_mode = #tpu.pipeline_mode<synchronous>, transform_indices = @transform_2, window_bounds = array<i64: 1, 32>}, {pipeline_mode = #tpu.pipeline_mode<synchronous>, transform_indices = @transform_3, window_bounds = array<i64: 32, 64>}, {pipeline_mode = #tpu.pipeline_mode<synchronous>, transform_indices = @transform_4, window_bounds = array<i64: 1, 64>}, {pipeline_mode = #tpu.pipeline_mode<synchronous>, transform_indices = @transform_5, window_bounds = array<i64: 1, 64>}, {pipeline_mode = #tpu.pipeline_mode<synchronous>, transform_indices = @transform_6, window_bounds = array<i64: 1, 64>}, {transform_indices = @transform_7, window_bounds = array<i64: 16, 64>}]} {
    %c0 = arith.constant 0 : index
    %c0_0 = arith.constant 0 : index
    %0 = vector.load %arg1[%c0, %c0_0] : memref<16x32xf32, #tpu.memory_space<vmem>>, vector<16x32xf32>
    %c0_1 = arith.constant 0 : index
    %c0_2 = arith.constant 0 : index
    %1 = vector.load %arg2[%c0_1, %c0_2] : memref<32x32xf32, #tpu.memory_space<vmem>>, vector<32x32xf32>
    %cst = arith.constant dense<0.000000e+00> : vector<16x32xf32>
    %2 = tpu.matmul %0, %1, %cst {dimension_numbers = #tpu.dot_dimension_numbers<[1], [0], [0], [1], [0, 0, 1, 1], [], []>} : vector<16x32xf32>, vector<32x32xf32>, vector<16x32xf32> -> vector<16x32xf32>
    %c0_3 = arith.constant 0 : index
    %c0_4 = arith.constant 0 : index
    %3 = vector.load %arg3[%c0_3, %c0_4] : memref<1x32xf32, #tpu.memory_space<vmem>>, vector<1x32xf32>
    %4 = vector.broadcast %3 : vector<1x32xf32> to vector<16x32xf32>
    %5 = arith.addf %2, %4 : vector<16x32xf32>
    %cst_5 = arith.constant 5.000000e-01 : f32
    %6 = vector.broadcast %cst_5 : f32 to vector<16x32xf32>
    %7 = arith.mulf %6, %5 : vector<16x32xf32>
    %cst_6 = arith.constant 0.707106769 : f32
    %8 = vector.broadcast %cst_6 : f32 to vector<16x32xf32>
    %9 = arith.mulf %5, %8 : vector<16x32xf32>
    %10 = math.erf %9 : vector<16x32xf32>
    %cst_7 = arith.constant 1.000000e+00 : f32
    %11 = vector.broadcast %cst_7 : f32 to vector<16x32xf32>
    %12 = arith.addf %11, %10 : vector<16x32xf32>
    %13 = arith.mulf %7, %12 : vector<16x32xf32>
    %c0_8 = arith.constant 0 : index
    %c0_9 = arith.constant 0 : index
    %14 = vector.load %arg4[%c0_8, %c0_9] : memref<32x64xf32, #tpu.memory_space<vmem>>, vector<32x64xf32>
    %cst_10 = arith.constant dense<0.000000e+00> : vector<16x64xf32>
    %15 = tpu.matmul %13, %14, %cst_10 {dimension_numbers = #tpu.dot_dimension_numbers<[1], [0], [0], [1], [0, 0, 1, 1], [], []>} : vector<16x32xf32>, vector<32x64xf32>, vector<16x64xf32> -> vector<16x64xf32>
    %c0_11 = arith.constant 0 : index
    %c0_12 = arith.constant 0 : index
    %16 = vector.load %arg5[%c0_11, %c0_12] : memref<1x64xf32, #tpu.memory_space<vmem>>, vector<1x64xf32>
    %17 = vector.broadcast %16 : vector<1x64xf32> to vector<16x64xf32>
    %18 = arith.addf %15, %17 : vector<16x64xf32>
    %cst_13 = arith.constant dense<0.000000e+00> : vector<16xf32>
    %19 = vector.multi_reduction <add>, %18, %cst_13 [1] : vector<16x64xf32> to vector<16xf32>
    %20 = vector.shape_cast %19 : vector<16xf32> to vector<16x1xf32>
    %21 = arith.mulf %18, %18 : vector<16x64xf32>
    %cst_14 = arith.constant dense<0.000000e+00> : vector<16xf32>
    %22 = vector.multi_reduction <add>, %21, %cst_14 [1] : vector<16x64xf32> to vector<16xf32>
    %23 = vector.shape_cast %22 : vector<16xf32> to vector<16x1xf32>
    %cst_15 = arith.constant 1.562500e-02 : f32
    %24 = vector.broadcast %cst_15 : f32 to vector<16x1xf32>
    %25 = arith.mulf %20, %24 : vector<16x1xf32>
    %cst_16 = arith.constant 1.562500e-02 : f32
    %26 = vector.broadcast %cst_16 : f32 to vector<16x1xf32>
    %27 = arith.mulf %23, %26 : vector<16x1xf32>
    %28 = arith.mulf %25, %25 : vector<16x1xf32>
    %29 = arith.subf %27, %28 : vector<16x1xf32>
    %30 = vector.broadcast %25 : vector<16x1xf32> to vector<16x64xf32>
    %31 = arith.subf %18, %30 : vector<16x64xf32>
    %cst_17 = arith.constant 9.99999974E-6 : f32
    %32 = vector.broadcast %cst_17 : f32 to vector<16x1xf32>
    %33 = arith.addf %29, %32 : vector<16x1xf32>
    %34 = math.rsqrt %33 : vector<16x1xf32>
    %35 = vector.broadcast %34 : vector<16x1xf32> to vector<16x64xf32>
    %36 = arith.mulf %31, %35 : vector<16x64xf32>
    %c0_18 = arith.constant 0 : index
    %c0_19 = arith.constant 0 : index
    %37 = vector.load %arg6[%c0_18, %c0_19] : memref<1x64xf32, #tpu.memory_space<vmem>>, vector<1x64xf32>
    %38 = vector.broadcast %37 : vector<1x64xf32> to vector<16x64xf32>
    %39 = arith.mulf %36, %38 : vector<16x64xf32>
    %c0_20 = arith.constant 0 : index
    %c0_21 = arith.constant 0 : index
    %40 = vector.load %arg7[%c0_20, %c0_21] : memref<1x64xf32, #tpu.memory_space<vmem>>, vector<1x64xf32>
    %41 = vector.broadcast %40 : vector<1x64xf32> to vector<16x64xf32>
    %42 = arith.addf %39, %41 : vector<16x64xf32>
    %c0_22 = arith.constant 0 : index
    %c0_23 = arith.constant 0 : index
    %43 = vector.load %arg8[%c0_22, %c0_23] : memref<16x64xf32, #tpu.memory_space<vmem>>, vector<16x64xf32>
    tpu.vector_store %arg8[%c0_22, %c0_23], %42 {strides = array<i32>} : memref<16x64xf32, #tpu.memory_space<vmem>>, vector<16x64xf32>,
    return
  }
  func.func @transform_0(%arg0: i32) -> (i32, i32) {
    %c0_i32 = arith.constant 0 : i32
    %c0_i32_0 = arith.constant 0 : i32
    return %arg0, %c0_i32 : i32, i32
  }
  func.func @transform_1(%arg0: i32) -> (i32, i32) {
    %c0_i32 = arith.constant 0 : i32
    %c0_i32_0 = arith.constant 0 : i32
    %c0_i32_1 = arith.constant 0 : i32
    return %c0_i32, %c0_i32_0 : i32, i32
  }
  func.func @transform_2(%arg0: i32) -> (i32, i32) {
    %c0_i32 = arith.constant 0 : i32
    %c0_i32_0 = arith.constant 0 : i32
    %c0_i32_1 = arith.constant 0 : i32
    return %c0_i32, %c0_i32_0 : i32, i32
  }
  func.func @transform_3(%arg0: i32) -> (i32, i32) {
    %c0_i32 = arith.constant 0 : i32
    %c0_i32_0 = arith.constant 0 : i32
    %c0_i32_1 = arith.constant 0 : i32
    return %c0_i32, %c0_i32_0 : i32, i32
  }
  func.func @transform_4(%arg0: i32) -> (i32, i32) {
    %c0_i32 = arith.constant 0 : i32
    %c0_i32_0 = arith.constant 0 : i32
    %c0_i32_1 = arith.constant 0 : i32
    return %c0_i32, %c0_i32_0 : i32, i32
  }
  func.func @transform_5(%arg0: i32) -> (i32, i32) {
    %c0_i32 = arith.constant 0 : i32
    %c0_i32_0 = arith.constant 0 : i32
    %c0_i32_1 = arith.constant 0 : i32
    return %c0_i32, %c0_i32_0 : i32, i32
  }
  func.func @transform_6(%arg0: i32) -> (i32, i32) {
    %c0_i32 = arith.constant 0 : i32
    %c0_i32_0 = arith.constant 0 : i32
    %c0_i32_1 = arith.constant 0 : i32
    return %c0_i32, %c0_i32_0 : i32, i32
  }
  func.func @transform_7(%arg0: i32) -> (i32, i32) {
    %c0_i32 = arith.constant 0 : i32
    %c0_i32_0 = arith.constant 0 : i32
    return %arg0, %c0_i32 : i32, i32
  }
}

</mosaic_0001>

<bundles_post_ra>
// kernel: tpu_custom_call.1
= control target key start
LH: loop header
LB: loop body
LE: loop exit
PB: predicated region body
PF: predicated region fallthrough
CT: control target
= control target key end

     0   :  { %12 = vsyncpa [#allocation3], 0  ;;  %s635_s0 = inlined_call_operand.hbm [shape: f32[16,32], index: 0, kind: input, shape index: {}]   ;;  %s636_s1 = inlined_call_operand.hbm [shape: f32[32,32], index: 1, kind: input, shape index: {}]   ;;  %s637_s2 = inlined_call_operand.vmem [shape: f32[1,32], index: 2, kind: input, shape index: {}]   ;;  %s638_s3 = inlined_call_operand.hbm [shape: f32[32,64], index: 3, kind: input, shape index: {}]   ;;  %s639_s4 = inlined_call_operand.vmem [shape: f32[1,64], index: 4, kind: input, shape index: {}]   ;;  %s640_s5 = inlined_call_operand.vmem [shape: f32[1,64], index: 5, kind: input, shape index: {}]   ;;  %s641_s6 = inlined_call_operand.vmem [shape: f32[1,64], index: 6, kind: input, shape index: {}]   ;;  %s642_s7 = inlined_call_operand.hbm [shape: f32[16,64], index: 7, kind: output, shape index: {}]  }
   0x1   :  { %13 = vsyncpa [#allocation6], 0 }
   0x2   :  { %14 = vsyncpa [#allocation4], 0  ;;  %s500_s24 = smov [#allocation5]   ;;  %s501_s26 = smov [#allocation2]  }
   0x3   :  { %s32_s25 = sshll.u32 %s500_s24, 4  ;;  %s20_s27 = sshll.u32 %s501_s26, 4  ;;  %s33_s25 = int_to_ptr.vmem [resolvable:$true] %s32_s25  ;;  %s546_s27 = int_to_ptr.vmem [resolvable:$true] %s20_s27 }
   0x4   :  { %s406_s30 = scalar_lea.hbm %s636_s1, 512 }
   0x5   :  { %p407_p0 = scmp.ne.s32.totalorder %s636_s1, %s406_s30  ;;  %p410_p1 = scmp.lt.u32.totalorder %s406_s30, %s636_s1 }
   0x7   :  { %p412_p2 = pnand %p410_p1, %p407_p0 }
   0x9   :  { %415 = shalt.err (!%p412_p2)
}
   0xa   :  { %s416_s12 = scalar_lea.vmem %s33_s25, 512  ;;  %p421_p4 = scmp.lt.s32.totalorder %s33_s25, %s33_s25 }
   0xb   :  { %p417_p3 = scmp.ne.s32.totalorder %s33_s25, %s416_s12  ;;  %p422_p5 = scmp.lt.s32.totalorder %s416_s12, %s416_s12 }
   0xd   :  { %p423_p6 = por %p422_p5, %p421_p4 }
   0xf   :  { %p424_p7 = pnand %p423_p6, %p417_p3 }
  0x11   :  { %427 = shalt.err (!%p424_p7)
}
  0x12   :  { %s502_s13 = smov 128   ;;  %s503_s14 = smov 8  }
  0x13   :  { %38 = dma.hbm_to_vmem [thread:$0]  %s636_s1, 512, %s33_s25, [#allocation6], %s502_s13, %s502_s13, %s503_s14  }
  0x14   :  { %s428_s19 = scalar_lea.hbm %s635_s0, 256 }
  0x15   :  { %p429_p8 = scmp.ne.s32.totalorder %s635_s0, %s428_s19  ;;  %p432_p9 = scmp.lt.u32.totalorder %s428_s19, %s635_s0 }
  0x17   :  { %p434_p10 = pnand %p432_p9, %p429_p8 }
  0x19   :  { %437 = shalt.err (!%p434_p10)
}
  0x1a   :  { %s438_s24 = scalar_lea.vmem %s546_s27, 256  ;;  %p443_p12 = scmp.lt.s32.totalorder %s546_s27, %s546_s27 }
  0x1b   :  { %p439_p11 = scmp.ne.s32.totalorder %s546_s27, %s438_s24  ;;  %p444_p13 = scmp.lt.s32.totalorder %s438_s24, %s438_s24 }
  0x1d   :  { %p445_p0 = por %p444_p13, %p443_p12 }
  0x1f   :  { %p446_p1 = pnand %p445_p0, %p439_p11 }
  0x21   :  { %449 = shalt.err (!%p446_p1)
}
  0x22   :  { %26 = dma.hbm_to_vmem [thread:$0]  %s635_s0, 256, %s546_s27, [#allocation3], %s502_s13, %s502_s13, %s503_s14  }
  0x23   :  { %s504_s26 = smov [#allocation7]   ;;  %s450_s8 = scalar_lea.hbm %s638_s3, 512 }
  0x24   :  { %s46_s28 = sshll.u32 %s504_s26, 4  ;;  %p451_p2 = scmp.ne.s32.totalorder %s638_s3, %s450_s8  ;;  %s47_s28 = int_to_ptr.vmem [resolvable:$true] %s46_s28 }
  0x25   :  { %p454_p3 = scmp.lt.u32.totalorder %s450_s8, %s638_s3 }
  0x27   :  { %p456_p4 = pnand %p454_p3, %p451_p2 }
  0x29   :  { %459 = shalt.err (!%p456_p4)
}
  0x2a   :  { %s460_s15 = scalar_lea.vmem %s47_s28, 512  ;;  %p465_p6 = scmp.lt.s32.totalorder %s47_s28, %s47_s28 }
  0x2b   :  { %p461_p5 = scmp.ne.s32.totalorder %s47_s28, %s460_s15  ;;  %p466_p7 = scmp.lt.s32.totalorder %s460_s15, %s460_s15 }
  0x2d   :  { %p467_p8 = por %p466_p7, %p465_p6 }
  0x2f   :  { %p468_p9 = pnand %p467_p8, %p461_p5 }
  0x31   :  { %471 = shalt.err (!%p468_p9)
}
  0x32   :  { %52 = dma.hbm_to_vmem [thread:$0]  %s638_s3, 512, %s47_s28, [#allocation6], %s502_s13, %s502_s13, %s503_s14  }
  0x33   :  { %494 = dma.done.wait [#allocation3], 256  }
  0x34   :  { %495 = vsyncadd [#allocation3], 4294967040 }
  0x35   :  { %496 = dma.done.wait [#allocation6], 1024  }
  0x36   :  { %497 = vsyncadd [#allocation6], 4294966272  ;;  %vm81_vm0 = vcmask 261120   ;;  %v70_v0 = vld [vmem:[#allocation5] sm:$0xff]  ;;  %v71_v1 = vld [vmem:[#allocation5 + $0x8] sm:$0xff]  ;;  %vm265_vm1 = vcmask 523264  }
  0x37   :  { %v72_v2 = vld [vmem:[#allocation5 + $0x10] sm:$0xff]  ;;  %v376_v3 = vpack.c.bf16 %v71_v1, %v70_v0  ;;  %v73_v4 = vld [vmem:[#allocation5 + $0x18] sm:$0xff]  ;;  %v173_v8 = vld [vmem:[#allocation7] sm:$0xff]  ;;  %s505_s21 = smov [#allocation8]  }
  0x38   :  { %v68_v5 = vld [vmem:[#allocation2] sm:$0xff]  ;;  %v380_v6 = vpack.c.bf16 %v73_v4, %v72_v2  ;;  %v69_v7 = vld [vmem:[#allocation2 + $0x8] sm:$0xff]  ;;  %v174_v9 = vld [vmem:[#allocation7 + $0x8] sm:$0xff]  ;;  %s321_s22 = sshll.u32 %s505_s21, 4  ;;  %s322_s22 = int_to_ptr.vmem [resolvable:$true] %s321_s22 }
  0x39   :  { %362 = vmatprep.mubr.msk.f32.mxu0 %vm81_vm0, %v68_v5  ;;  %377 = vmatprep.subr.bf16.mxu0 %v376_v3  ;;  %v384_v10 = vpack.c.bf16 %v174_v9, %v173_v8  ;;  %v175_v11 = vld [vmem:[#allocation7 + $0x10] sm:$0xff]  ;;  %v176_v12 = vld [vmem:[#allocation7 + $0x18] sm:$0xff]  ;;  %p477_p11 = scmp.lt.s32.totalorder %s322_s22, %s322_s22 }
  0x3a   :  { %379 = vmatpush3.bf16.msra.mxu0 %v376_v3  ;;  %v388_v13 = vpack.c.bf16 %v176_v12, %v175_v11  ;;  %v334_v14 = vld [vmem:[%s637_s2] ss:$0 sm:$0xff] }
  0x3b   :  { %381 = vmatprep.subr.bf16.mxu0 %v380_v6  ;;  %385 = vmatprep.subr.bf16.mxu1 %v384_v10  ;;  %v337_v29 = vld [vmem:[%s639_s4] ss:$0 sm:$0xff] }
  0x3c   :  { %387 = vmatpush3.bf16.msra.mxu1 %v384_v10  ;;  %v340_v56 = vld [vmem:[%s640_s5] ss:$0 sm:$0xff]  ;;  %s472_s5 = scalar_lea.vmem %s322_s22, 256 }
  0x3d   :  { %389 = vmatprep.subr.bf16.mxu1 %v388_v13  ;;  %v341_v58 = vld [vmem:[%s641_s6] ss:$0 sm:$0xff]  ;;  %p473_p10 = scmp.ne.s32.totalorder %s322_s22, %s472_s5  ;;  %p478_p12 = scmp.lt.s32.totalorder %s472_s5, %s472_s5 }
  0x3e   :  { %383 = vmatpush3.bf16.msra.mxu0 %v380_v6 }
  0x3f   :  { %p479_p13 = por %p478_p12, %p477_p11 }
  0x40   :  { %391 = vmatpush3.bf16.msra.mxu1 %v388_v13 }
  0x41   :  { %363 = vmatmul.mubr.msk.f32.vlgmr.msra.gmra.mrb[0].mxu0 %vm81_vm0, %v69_v7  ;;  %p480_p0 = pnand %p479_p13, %p473_p10 }
 0x114   :  { %v364_v15 = vpop.f32.mrb[0].mxu0 }
 0x115   :  { %v160_v16 = vadd.f32 %v364_v15, %v334_v14  ;;  %v154_v17 = vpop.f32.mrb[1].mxu0 }
 0x116   :  { %v155_v18 = vadd.f32 %v334_v14, %v154_v17 }
 0x117   :  { %v166_v19 = vmul.f32 0.70710677, %v160_v16  ;;  %v164_v26 = vmul.f32 0.5, %v160_v16 }
 0x118   :  { %v165_v20 = vmul.f32 0.70710677, %v155_v18  ;;  %v163_v24 = vmul.f32 0.5, %v155_v18 }
 0x119   :  { %398 = verf.f32 %v166_v19 }
 0x11a   :  { %400 = verf.f32 %v165_v20 }
 0x123   :  { %v399_v21 = vpop.eup %398 }
 0x124   :  { %v401_v22 = vpop.eup %400  ;;  %v170_v23 = vadd.f32 1.0, %v399_v21 }
 0x125   :  { %v169_v25 = vadd.f32 1.0, %v401_v22 }
 0x126   :  { %v172_v28 = vmul.f32 %v170_v23, %v164_v26 }
 0x127   :  { %v171_v27 = vmul.f32 %v169_v25, %v163_v24 }
 0x129   :  { %373 = vmatprep.mubr.msk.f32.mxu1 %vm81_vm0, %v171_v27 }
 0x12a   :  { %374 = vmatmul.mubr.msk.f32.vlgmr.msra.gmra.mrb[0].mxu1 %vm81_vm0, %v172_v28 }
 0x1fd   :  { %v375_v30 = vpop.f32.mrb[0].mxu1 }
 0x1fe   :  { %v256_v31 = vpop.f32.mrb[1].mxu1  ;;  %v262_v32 = vadd.f32 %v375_v30, %v337_v29 }
 0x1ff   :  { %v257_v33 = vadd.f32 %v337_v29, %v256_v31 }
 0x200   :  { %v273_v37 = vmul.f32 %v262_v32, %v262_v32  ;;  %v269_v38 = vsel %vm265_vm1, %v262_v32, 0.0 }
 0x201   :  { %v266_v34 = vsel %vm265_vm1, %v257_v33, 0.0  ;;  %v272_v35 = vmul.f32 %v257_v33, %v257_v33 }
 0x202   :  { %267 = vadd.xlane.f32.xlu0 %v266_v34  ;;  %v277_v39 = vsel %vm265_vm1, %v273_v37, 0.0 }
 0x203   :  { %v274_v36 = vsel %vm265_vm1, %v272_v35, 0.0 }
 0x204   :  { %275 = vadd.xlane.f32.xlu1 %v274_v36 }
 0x206   :  { %270 = vadd.xlane.f32.xlu0 %v269_v38 }
 0x208   :  { %278 = vadd.xlane.f32.xlu1 %v277_v39 }
 0x28f   :  { %v268_v40 = vpop.xlane.xlu0 %267 }
 0x290   :  { %v280_v41 = vmul.f32 0.015625, %v268_v40 }
 0x291   :  { %v276_v42 = vpop.xlane.xlu1 %275 }
 0x292   :  { %v284_v43 = vmul.f32 %v280_v41, %v280_v41  ;;  %v282_v44 = vmul.f32 0.015625, %v276_v42  ;;  %v288_v54 = vsub.f32 %v257_v33, %v280_v41 }
 0x293   :  { %v271_v45 = vpop.xlane.xlu0 %270 }
 0x294   :  { %v286_v46 = vsub.f32 %v282_v44, %v284_v43  ;;  %v281_v47 = vmul.f32 0.015625, %v271_v45 }
 0x295   :  { %v279_v48 = vpop.xlane.xlu1 %278 }
 0x296   :  { %v290_v49 = vadd.f32 1e-05, %v286_v46  ;;  %v285_v50 = vmul.f32 %v281_v47, %v281_v47  ;;  %v283_v51 = vmul.f32 0.015625, %v279_v48  ;;  %v289_v59 = vsub.f32 %v262_v32, %v281_v47 }
 0x298   :  { %402 = vrsqrt.f32 %v290_v49  ;;  %v287_v52 = vsub.f32 %v283_v51, %v285_v50 }
 0x29a   :  { %v291_v53 = vadd.f32 1e-05, %v287_v52 }
 0x29c   :  { %404 = vrsqrt.f32 %v291_v53 }
 0x2a2   :  { %v403_v55 = vpop.eup %402 }
 0x2a3   :  { %v294_v57 = vmul.f32 %v403_v55, %v288_v54 }
 0x2a5   :  { %v303_v60 = vmul.f32 %v340_v56, %v294_v57 }
 0x2a6   :  { %v405_v61 = vpop.eup %404 }
 0x2a7   :  { %v295_v62 = vmul.f32 %v405_v61, %v289_v59  ;;  %v312_v63 = vadd.f32 %v341_v58, %v303_v60 }
 0x2a9   :  { %v304_v0 = vmul.f32 %v340_v56, %v295_v62  ;;  %314 = vst.msk [vmem:[#allocation8] sm:$0xff] %vm265_vm1, %v312_v63 }
 0x2ab   :  { %v313_v1 = vadd.f32 %v341_v58, %v304_v0 }
 0x2ad   :  { %315 = vst.msk [vmem:[#allocation8 + $0x8] sm:$0xff] %vm265_vm1, %v313_v1 }
 0x2ae   :  { %483 = shalt.err (!%p480_p0)
}
 0x2af   :  { %s484_s24 = scalar_lea.hbm %s642_s7, 256 }
 0x2b0   :  { %p485_p1 = scmp.ne.s32.totalorder %s642_s7, %s484_s24  ;;  %p488_p2 = scmp.lt.u32.totalorder %s484_s24, %s642_s7 }
 0x2b2   :  { %p490_p3 = pnand %p488_p2, %p485_p1 }
 0x2b4   :  { %493 = shalt.err (!%p490_p3)
}
 0x2b5   :  { %327 = dma.vmem_to_hbm [thread:$0]  %s322_s22, 256, %s642_s7, [#allocation4], %s502_s13, %s502_s13, %s503_s14  }
 0x2b6   :  { %498 = dma.done.wait [#allocation4], 256  }
 0x2b7   :  { %499 = vsyncadd [#allocation4], 4294967040 }
 0x2b8   :  { %331 = vsyncpa [#allocation3], 1 }
 0x2b9   :  { %332 = vsyncpa [#allocation6], 1 }
 0x2ba   :  { %333 = vsyncpa [#allocation4], 1 }

</bundles_post_ra>
